<compile_context>
chip_gen: v5e
topology: v5e:2x2
jax: 0.10.0
libtpu: 0.0.40
codegen_flags: <defaults>
</compile_context>

<pallas_src>
import functools

import jax
import jax.numpy as jnp
import numpy as np
from jax.experimental import pallas as pl
from jax.experimental.pallas import tpu as pltpu


def _dice_kernel(x_ref, y_ref, out_ref,
                 acc_int_ref, acc_pred_ref, acc_gt_ref,
                 *, smooth, channels):
    s = pl.program_id(1)
    n_s = pl.num_programs(1)

    @pl.when(s == 0)
    def _init():
        acc_int_ref[...] = jnp.zeros_like(acc_int_ref)
        acc_pred_ref[...] = jnp.zeros_like(acc_pred_ref)
        acc_gt_ref[...] = jnp.zeros_like(acc_gt_ref)

    x = x_ref[0]                        # (C, R, 128) float32
    lab = y_ref[0].astype(jnp.int32)    # (R, 128) class ids (padding = -1)

    # One-hot via per-channel scalar compare (unrolled over static C);
    # sublane (row) reduction per tile, lane reduction deferred to finalize.
    inter_parts = []
    gt_parts = []
    for c in range(channels):
        hit = lab == c                                           # (R, 128) bool
        xm = jnp.where(hit, x[c], 0.0)                           # (R, 128)
        inter_parts.append(jnp.sum(xm, axis=0, keepdims=True))   # (1, 128)
        gt_parts.append(jnp.sum(hit.astype(jnp.float32), axis=0,
                                keepdims=True))                  # (1, 128)

    acc_int_ref[...] += jnp.concatenate(inter_parts, axis=0)     # (C, 128)
    acc_gt_ref[...] += jnp.concatenate(gt_parts, axis=0)         # (C, 128)
    acc_pred_ref[...] += jnp.sum(x, axis=1)                      # (C, 128)

    @pl.when(s == n_s - 1)
    def _finalize():
        intersect = jnp.sum(acc_int_ref[...], axis=1, keepdims=True)  # (C, 1)
        sum_pred = jnp.sum(acc_pred_ref[...], axis=1, keepdims=True)  # (C, 1)
        sum_gt = jnp.sum(acc_gt_ref[...], axis=1, keepdims=True)      # (C, 1)
        # Exact divide (no approx reciprocal) to preserve the reference math.
        dc = (2.0 * intersect + smooth) / (sum_gt + sum_pred + smooth)
        dice_sum = jnp.sum(dc)          # sum over channels for this batch

        r = jax.lax.broadcasted_iota(jnp.int32, (8, 128), 0)
        l = jax.lax.broadcasted_iota(jnp.int32, (8, 128), 1)
        out_ref[0] = jnp.where((r == 0) & (l == 0), dice_sum, 0.0)


def custom_dice(x, y, smooth=1e-6):
    """Pallas equivalent of CustomDice.forward(x, y) for integer label maps."""
    shp_x = x.shape
    if y.ndim != x.ndim:
        y = y.reshape((y.shape[0], 1) + y.shape[1:])

    if y.shape == tuple(shp_x):
        # TODO(synk): one-hot / soft-label passthrough branch not kernelized
        # (nnU-Net passes integer label maps in practice).
        raise NotImplementedError("expected integer label map, not one-hot targets")

    B, C = int(shp_x[0]), int(shp_x[1])
    S = int(np.prod(shp_x[2:]))

    # Labels as int8 (4x fewer HBM bytes) whenever the class count allows it.
    label_dtype = jnp.int8 if C <= 127 else jnp.int32

    # Spatial layout: lanes = 128, sublanes = rows. Tile rows so the f32 x
    # block stays ~2 MiB (double-buffered <= ~5 MiB incl. labels) -> fits the
    # scoped VMEM defaults on v5e (16 MiB), v6e (32 MiB) and v7x (32/64 MiB).
    rows = (S + 127) // 128
    target_block_bytes = 2 * 1024 * 1024
    rows_budget = max(32, target_block_bytes // (C * 128 * 4))
    if rows <= rows_budget:
        rows_tile = rows                       # single spatial tile, no row pad
    else:
        rows_tile = (rows_budget // 32) * 32   # 32-aligned for int8 label tiles
    rows_padded = ((rows + rows_tile - 1) // rows_tile) * rows_tile
    S_pad = rows_padded * 128

    x_flat = jnp.reshape(x.astype(jnp.float32), (B, C, S))
    y_flat = jnp.reshape(y, (B, S)).astype(label_dtype)

    # Padding only when S is not already lane/tile aligned (typical nnU-Net
    # volumes are); pad value 0 for x (adds nothing) and -1 for labels
    # (matches no class), so the result stays exact.
    if S_pad != S:
        x_flat = jnp.pad(x_flat, ((0, 0), (0, 0), (0, S_pad - S)))
        y_flat = jnp.pad(y_flat, ((0, 0), (0, S_pad - S)), constant_values=-1)

    x_tiled = x_flat.reshape(B, C, rows_padded, 128)
    y_tiled = y_flat.reshape(B, rows_padded, 128)
    num_s = rows_padded // rows_tile

    kernel = functools.partial(_dice_kernel, smooth=float(smooth), channels=C)

    out = pl.pallas_call(
        kernel,
        out_shape=jax.ShapeDtypeStruct((B, 8, 128), jnp.float32),
        grid_spec=pltpu.PrefetchScalarGridSpec(
            num_scalar_prefetch=0,
            grid=(B, num_s),
            in_specs=[
                pl.BlockSpec((1, C, rows_tile, 128), lambda b, s: (b, 0, s, 0)),
                pl.BlockSpec((1, rows_tile, 128), lambda b, s: (b, s, 0)),
            ],
            out_specs=pl.BlockSpec((1, 8, 128), lambda b, s: (b, 0, 0)),
            scratch_shapes=[
                pltpu.VMEM((C, 128), jnp.float32),   # intersect partials
                pltpu.VMEM((C, 128), jnp.float32),   # sum_pred partials
                pltpu.VMEM((C, 128), jnp.float32),   # sum_gt partials
            ],
        ),
        compiler_params=pltpu.CompilerParams(
            dimension_semantics=("parallel", "arbitrary")),
    )(x_tiled, y_tiled)

    # Per-batch channel-sums live at out[b, 0, 0]; everything else is 0.
    return jnp.sum(out) / jnp.float32(B * C)


def _reference_dice(x, y, smooth=1e-6):
    """Pure-JAX reference matching the torch semantics (label-map branch)."""
    if y.ndim != x.ndim:
        y = y.reshape((y.shape[0], 1) + y.shape[1:])
    B, C = x.shape[0], x.shape[1]
    gt = jnp.squeeze(y.astype(jnp.int32), axis=1)                    # (B, *sp)
    y_onehot = jax.nn.one_hot(gt, C, axis=1, dtype=jnp.float32)      # (B, C, *sp)
    axes = tuple(range(2, x.ndim))
    intersect = jnp.sum(x * y_onehot, axis=axes)
    sum_pred = jnp.sum(x, axis=axes)
    sum_gt = jnp.sum(y_onehot, axis=axes)
    dc = (2.0 * intersect + smooth) / (sum_gt + sum_pred + smooth)
    return jnp.mean(dc)


if __name__ == "__main__":
    key = jax.random.PRNGKey(0)
    kx, ky = jax.random.split(key)

    B, C, H, W = 2, 4, 16, 16
    # Soft predictions (e.g. softmax output) and an integer segmentation map.
    x = jax.nn.softmax(jax.random.normal(kx, (B, C, H, W), dtype=jnp.float32),
                       axis=1)
    y = jax.random.randint(ky, (B, 1, H, W), 0, C, dtype=jnp.int32)

    dc = custom_dice(x, y, smooth=1e-6)
    dc = jax.block_until_ready(dc)

    ref = _reference_dice(x, y, smooth=1e-6)
    assert jnp.allclose(dc, ref, atol=1e-5, rtol=1e-5), (dc, ref)

    print("KERNEL_OK")
</pallas_src>

<mosaic_0001>
module attributes {stable_mosaic.version = 11 : i64} {
  func.func @_dice_kernel(%arg0: i32, %arg1: i32, %arg2: memref<1x4x2x128xf32, #tpu.memory_space<vmem>>, %arg3: memref<1x2x128xi8, #tpu.memory_space<vmem>>, %arg4: memref<1x8x128xf32, #tpu.memory_space<vmem>>, %arg5: memref<4x128xf32, #tpu.memory_space<vmem>>, %arg6: memref<4x128xf32, #tpu.memory_space<vmem>>, %arg7: memref<4x128xf32, #tpu.memory_space<vmem>>) attributes {dimension_semantics = [#tpu.dimension_semantics<parallel>, #tpu.dimension_semantics<arbitrary>], iteration_bounds = array<i64: 2, 1>, scalar_prefetch = 0 : i64, scratch_operands = 3 : i64, tpu.core_type = #tpu.core_type<tc>, window_params = [{transform_indices = @transform_0, window_bounds = array<i64: 1, 4, 2, 128>}, {transform_indices = @transform_1, window_bounds = array<i64: 1, 2, 128>}, {transform_indices = @transform_2, window_bounds = array<i64: 1, 8, 128>}]} {
    %c0_i32 = arith.constant 0 : i32
    %0 = arith.cmpi eq, %arg1, %c0_i32 : i32
    %1 = arith.extui %0 : i1 to i32
    %c0_i32_0 = arith.constant 0 : i32
    %2 = arith.cmpi ne, %1, %c0_i32_0 : i32
    scf.if %2 {
      %cst_34 = arith.constant 0.000000e+00 : f32
      %71 = vector.broadcast %cst_34 : f32 to vector<4x128xf32>
      %c0_35 = arith.constant 0 : index
      %c0_36 = arith.constant 0 : index
      %72 = vector.load %arg5[%c0_35, %c0_36] : memref<4x128xf32, #tpu.memory_space<vmem>>, vector<4x128xf32>
      tpu.vector_store %arg5[%c0_35, %c0_36], %71 {strides = array<i32>} : memref<4x128xf32, #tpu.memory_space<vmem>>, vector<4x128xf32>,
      %cst_37 = arith.constant 0.000000e+00 : f32
      %73 = vector.broadcast %cst_37 : f32 to vector<4x128xf32>
      %c0_38 = arith.constant 0 : index
      %c0_39 = arith.constant 0 : index
      %74 = vector.load %arg6[%c0_38, %c0_39] : memref<4x128xf32, #tpu.memory_space<vmem>>, vector<4x128xf32>
      tpu.vector_store %arg6[%c0_38, %c0_39], %73 {strides = array<i32>} : memref<4x128xf32, #tpu.memory_space<vmem>>, vector<4x128xf32>,
      %cst_40 = arith.constant 0.000000e+00 : f32
      %75 = vector.broadcast %cst_40 : f32 to vector<4x128xf32>
      %c0_41 = arith.constant 0 : index
      %c0_42 = arith.constant 0 : index
      %76 = vector.load %arg7[%c0_41, %c0_42] : memref<4x128xf32, #tpu.memory_space<vmem>>, vector<4x128xf32>
      tpu.vector_store %arg7[%c0_41, %c0_42], %75 {strides = array<i32>} : memref<4x128xf32, #tpu.memory_space<vmem>>, vector<4x128xf32>,
    } else {
    }
    %c0 = arith.constant 0 : index
    %c0_1 = arith.constant 0 : index
    %c0_2 = arith.constant 0 : index
    %c0_3 = arith.constant 0 : index
    %3 = vector.load %arg2[%c0, %c0_1, %c0_2, %c0_3] : memref<1x4x2x128xf32, #tpu.memory_space<vmem>>, vector<1x4x2x128xf32>
    %4 = vector.shape_cast %3 : vector<1x4x2x128xf32> to vector<4x2x128xf32>
    %c0_4 = arith.constant 0 : index
    %c0_5 = arith.constant 0 : index
    %c0_6 = arith.constant 0 : index
    %5 = vector.load %arg3[%c0_4, %c0_5, %c0_6] : memref<1x2x128xi8, #tpu.memory_space<vmem>>, vector<1x2x128xi8>
    %6 = vector.shape_cast %5 : vector<1x2x128xi8> to vector<2x128xi8>
    %7 = arith.extsi %6 : vector<2x128xi8> to vector<2x128xi32>
    %c0_i32_7 = arith.constant 0 : i32
    %8 = vector.broadcast %c0_i32_7 : i32 to vector<2x128xi32>
    %9 = arith.cmpi eq, %7, %8 : vector<2x128xi32>
    %10 = vector.extract_strided_slice %4 {offsets = [0, 0, 0], sizes = [1, 2, 128], strides = [1, 1, 1]} : vector<4x2x128xf32> to vector<1x2x128xf32>
    %11 = vector.shape_cast %10 : vector<1x2x128xf32> to vector<2x128xf32>
    %cst = arith.constant 0.000000e+00 : f32
    %12 = vector.broadcast %cst : f32 to vector<2x128xf32>
    %13 = arith.select %9, %11, %12 : vector<2x128xi1>, vector<2x128xf32>
    %cst_8 = arith.constant dense<0.000000e+00> : vector<128xf32>
    %14 = vector.multi_reduction <add>, %13, %cst_8 [0] : vector<2x128xf32> to vector<128xf32>
    %15 = vector.shape_cast %14 : vector<128xf32> to vector<1x128xf32>
    %16 = arith.extui %9 : vector<2x128xi1> to vector<2x128xi32>
    %17 = arith.sitofp %16 : vector<2x128xi32> to vector<2x128xf32>
    %cst_9 = arith.constant dense<0.000000e+00> : vector<128xf32>
    %18 = vector.multi_reduction <add>, %17, %cst_9 [0] : vector<2x128xf32> to vector<128xf32>
    %19 = vector.shape_cast %18 : vector<128xf32> to vector<1x128xf32>
    %c1_i32 = arith.constant 1 : i32
    %20 = vector.broadcast %c1_i32 : i32 to vector<2x128xi32>
    %21 = arith.cmpi eq, %7, %20 : vector<2x128xi32>
    %22 = vector.extract_strided_slice %4 {offsets = [1, 0, 0], sizes = [1, 2, 128], strides = [1, 1, 1]} : vector<4x2x128xf32> to vector<1x2x128xf32>
    %23 = vector.shape_cast %22 : vector<1x2x128xf32> to vector<2x128xf32>
    %cst_10 = arith.constant 0.000000e+00 : f32
    %24 = vector.broadcast %cst_10 : f32 to vector<2x128xf32>
    %25 = arith.select %21, %23, %24 : vector<2x128xi1>, vector<2x128xf32>
    %cst_11 = arith.constant dense<0.000000e+00> : vector<128xf32>
    %26 = vector.multi_reduction <add>, %25, %cst_11 [0] : vector<2x128xf32> to vector<128xf32>
    %27 = vector.shape_cast %26 : vector<128xf32> to vector<1x128xf32>
    %28 = arith.extui %21 : vector<2x128xi1> to vector<2x128xi32>
    %29 = arith.sitofp %28 : vector<2x128xi32> to vector<2x128xf32>
    %cst_12 = arith.constant dense<0.000000e+00> : vector<128xf32>
    %30 = vector.multi_reduction <add>, %29, %cst_12 [0] : vector<2x128xf32> to vector<128xf32>
    %31 = vector.shape_cast %30 : vector<128xf32> to vector<1x128xf32>
    %c2_i32 = arith.constant 2 : i32
    %32 = vector.broadcast %c2_i32 : i32 to vector<2x128xi32>
    %33 = arith.cmpi eq, %7, %32 : vector<2x128xi32>
    %34 = vector.extract_strided_slice %4 {offsets = [2, 0, 0], sizes = [1, 2, 128], strides = [1, 1, 1]} : vector<4x2x128xf32> to vector<1x2x128xf32>
    %35 = vector.shape_cast %34 : vector<1x2x128xf32> to vector<2x128xf32>
    %cst_13 = arith.constant 0.000000e+00 : f32
    %36 = vector.broadcast %cst_13 : f32 to vector<2x128xf32>
    %37 = arith.select %33, %35, %36 : vector<2x128xi1>, vector<2x128xf32>
    %cst_14 = arith.constant dense<0.000000e+00> : vector<128xf32>
    %38 = vector.multi_reduction <add>, %37, %cst_14 [0] : vector<2x128xf32> to vector<128xf32>
    %39 = vector.shape_cast %38 : vector<128xf32> to vector<1x128xf32>
    %40 = arith.extui %33 : vector<2x128xi1> to vector<2x128xi32>
    %41 = arith.sitofp %40 : vector<2x128xi32> to vector<2x128xf32>
    %cst_15 = arith.constant dense<0.000000e+00> : vector<128xf32>
    %42 = vector.multi_reduction <add>, %41, %cst_15 [0] : vector<2x128xf32> to vector<128xf32>
    %43 = vector.shape_cast %42 : vector<128xf32> to vector<1x128xf32>
    %c3_i32 = arith.constant 3 : i32
    %44 = vector.broadcast %c3_i32 : i32 to vector<2x128xi32>
    %45 = arith.cmpi eq, %7, %44 : vector<2x128xi32>
    %46 = vector.extract_strided_slice %4 {offsets = [3, 0, 0], sizes = [1, 2, 128], strides = [1, 1, 1]} : vector<4x2x128xf32> to vector<1x2x128xf32>
    %47 = vector.shape_cast %46 : vector<1x2x128xf32> to vector<2x128xf32>
    %cst_16 = arith.constant 0.000000e+00 : f32
    %48 = vector.broadcast %cst_16 : f32 to vector<2x128xf32>
    %49 = arith.select %45, %47, %48 : vector<2x128xi1>, vector<2x128xf32>
    %cst_17 = arith.constant dense<0.000000e+00> : vector<128xf32>
    %50 = vector.multi_reduction <add>, %49, %cst_17 [0] : vector<2x128xf32> to vector<128xf32>
    %51 = vector.shape_cast %50 : vector<128xf32> to vector<1x128xf32>
    %52 = arith.extui %45 : vector<2x128xi1> to vector<2x128xi32>
    %53 = arith.sitofp %52 : vector<2x128xi32> to vector<2x128xf32>
    %cst_18 = arith.constant dense<0.000000e+00> : vector<128xf32>
    %54 = vector.multi_reduction <add>, %53, %cst_18 [0] : vector<2x128xf32> to vector<128xf32>
    %55 = vector.shape_cast %54 : vector<128xf32> to vector<1x128xf32>
    %c0_19 = arith.constant 0 : index
    %c0_20 = arith.constant 0 : index
    %56 = vector.load %arg5[%c0_19, %c0_20] : memref<4x128xf32, #tpu.memory_space<vmem>>, vector<4x128xf32>
    %57 = tpu.concatenate %15, %27, %39, %51 in 0 : vector<1x128xf32>, vector<1x128xf32>, vector<1x128xf32>, vector<1x128xf32> -> vector<4x128xf32>
    %58 = arith.addf %56, %57 : vector<4x128xf32>
    %c0_21 = arith.constant 0 : index
    %c0_22 = arith.constant 0 : index
    %59 = vector.load %arg5[%c0_21, %c0_22] : memref<4x128xf32, #tpu.memory_space<vmem>>, vector<4x128xf32>
    tpu.vector_store %arg5[%c0_21, %c0_22], %58 {strides = array<i32>} : memref<4x128xf32, #tpu.memory_space<vmem>>, vector<4x128xf32>,
    %c0_23 = arith.constant 0 : index
    %c0_24 = arith.constant 0 : index
    %60 = vector.load %arg7[%c0_23, %c0_24] : memref<4x128xf32, #tpu.memory_space<vmem>>, vector<4x128xf32>
    %61 = tpu.concatenate %19, %31, %43, %55 in 0 : vector<1x128xf32>, vector<1x128xf32>, vector<1x128xf32>, vector<1x128xf32> -> vector<4x128xf32>
    %62 = arith.addf %60, %61 : vector<4x128xf32>
    %c0_25 = arith.constant 0 : index
    %c0_26 = arith.constant 0 : index
    %63 = vector.load %arg7[%c0_25, %c0_26] : memref<4x128xf32, #tpu.memory_space<vmem>>, vector<4x128xf32>
    tpu.vector_store %arg7[%c0_25, %c0_26], %62 {strides = array<i32>} : memref<4x128xf32, #tpu.memory_space<vmem>>, vector<4x128xf32>,
    %c0_27 = arith.constant 0 : index
    %c0_28 = arith.constant 0 : index
    %64 = vector.load %arg6[%c0_27, %c0_28] : memref<4x128xf32, #tpu.memory_space<vmem>>, vector<4x128xf32>
    %cst_29 = arith.constant dense<0.000000e+00> : vector<4x128xf32>
    %65 = vector.multi_reduction <add>, %4, %cst_29 [1] : vector<4x2x128xf32> to vector<4x128xf32>
    %66 = arith.addf %64, %65 : vector<4x128xf32>
    %c0_30 = arith.constant 0 : index
    %c0_31 = arith.constant 0 : index
    %67 = vector.load %arg6[%c0_30, %c0_31] : memref<4x128xf32, #tpu.memory_space<vmem>>, vector<4x128xf32>
    tpu.vector_store %arg6[%c0_30, %c0_31], %66 {strides = array<i32>} : memref<4x128xf32, #tpu.memory_space<vmem>>, vector<4x128xf32>,
    %c0_i32_32 = arith.constant 0 : i32
    %68 = arith.cmpi eq, %arg1, %c0_i32_32 : i32
    %69 = arith.extui %68 : i1 to i32
    %c0_i32_33 = arith.constant 0 : i32
    %70 = arith.cmpi ne, %69, %c0_i32_33 : i32
    scf.if %70 {
      %c0_34 = arith.constant 0 : index
      %c0_35 = arith.constant 0 : index
      %71 = vector.load %arg5[%c0_34, %c0_35] : memref<4x128xf32, #tpu.memory_space<vmem>>, vector<4x128xf32>
      %cst_36 = arith.constant dense<0.000000e+00> : vector<4xf32>
      %72 = vector.multi_reduction <add>, %71, %cst_36 [1] : vector<4x128xf32> to vector<4xf32>
      %73 = vector.shape_cast %72 : vector<4xf32> to vector<4x1xf32>
      %c0_37 = arith.constant 0 : index
      %c0_38 = arith.constant 0 : index
      %74 = vector.load %arg6[%c0_37, %c0_38] : memref<4x128xf32, #tpu.memory_space<vmem>>, vector<4x128xf32>
      %cst_39 = arith.constant dense<0.000000e+00> : vector<4xf32>
      %75 = vector.multi_reduction <add>, %74, %cst_39 [1] : vector<4x128xf32> to vector<4xf32>
      %76 = vector.shape_cast %75 : vector<4xf32> to vector<4x1xf32>
      %c0_40 = arith.constant 0 : index
      %c0_41 = arith.constant 0 : index
      %77 = vector.load %arg7[%c0_40, %c0_41] : memref<4x128xf32, #tpu.memory_space<vmem>>, vector<4x128xf32>
      %cst_42 = arith.constant dense<0.000000e+00> : vector<4xf32>
      %78 = vector.multi_reduction <add>, %77, %cst_42 [1] : vector<4x128xf32> to vector<4xf32>
      %79 = vector.shape_cast %78 : vector<4xf32> to vector<4x1xf32>
      %cst_43 = arith.constant 2.000000e+00 : f32
      %80 = vector.broadcast %cst_43 : f32 to vector<4x1xf32>
      %81 = arith.mulf %80, %73 : vector<4x1xf32>
      %cst_44 = arith.constant 9.99999997E-7 : f32
      %82 = vector.broadcast %cst_44 : f32 to vector<4x1xf32>
      %83 = arith.addf %81, %82 : vector<4x1xf32>
      %84 = arith.addf %79, %76 : vector<4x1xf32>
      %cst_45 = arith.constant 9.99999997E-7 : f32
      %85 = vector.broadcast %cst_45 : f32 to vector<4x1xf32>
      %86 = arith.addf %84, %85 : vector<4x1xf32>
      %87 = arith.divf %83, %86 : vector<4x1xf32>
      %88 = vector.shape_cast %87 : vector<4x1xf32> to vector<1x4x1xf32>
      %cst_46 = arith.constant dense<0.000000e+00> : vector<1xf32>
      %89 = vector.multi_reduction <add>, %88, %cst_46 [1, 2] : vector<1x4x1xf32> to vector<1xf32>
      %90 = vector.shape_cast %89 : vector<1xf32> to vector<1x1x1xf32>
      %91 = vector.extract %90[0, 0, 0] : f32 from vector<1x1x1xf32>
      %92 = tpu.iota {dimensions = array<i32: 0>} : vector<8x128xi32>
      %93 = tpu.iota {dimensions = array<i32: 1>} : vector<8x128xi32>
      %c0_i32_47 = arith.constant 0 : i32
      %94 = vector.broadcast %c0_i32_47 : i32 to vector<8x128xi32>
      %95 = arith.cmpi eq, %92, %94 : vector<8x128xi32>
      %c0_i32_48 = arith.constant 0 : i32
      %96 = vector.broadcast %c0_i32_48 : i32 to vector<8x128xi32>
      %97 = arith.cmpi eq, %93, %96 : vector<8x128xi32>
      %98 = arith.andi %95, %97 : vector<8x128xi1>
      %cst_49 = arith.constant 0.000000e+00 : f32
      %99 = vector.broadcast %91 : f32 to vector<8x128xf32>
      %100 = vector.broadcast %cst_49 : f32 to vector<8x128xf32>
      %101 = arith.select %98, %99, %100 : vector<8x128xi1>, vector<8x128xf32>
      %c0_50 = arith.constant 0 : index
      %c0_51 = arith.constant 0 : index
      %c0_52 = arith.constant 0 : index
      %102 = vector.load %arg4[%c0_50, %c0_51, %c0_52] : memref<1x8x128xf32, #tpu.memory_space<vmem>>, vector<1x8x128xf32>
      %103 = vector.shape_cast %102 : vector<1x8x128xf32> to vector<8x128xf32>
      %104 = vector.shape_cast %101 : vector<8x128xf32> to vector<1x8x128xf32>
      tpu.vector_store %arg4[%c0_50, %c0_51, %c0_52], %104 {strides = array<i32>} : memref<1x8x128xf32, #tpu.memory_space<vmem>>, vector<1x8x128xf32>,
    } else {
    }
    return
  }
  func.func @transform_0(%arg0: i32, %arg1: i32) -> (i32, i32, i32, i32) {
    %c0_i32 = arith.constant 0 : i32
    %c0_i32_0 = arith.constant 0 : i32
    %c0_i32_1 = arith.constant 0 : i32
    return %arg0, %c0_i32, %arg1, %c0_i32_0 : i32, i32, i32, i32
  }
  func.func @transform_1(%arg0: i32, %arg1: i32) -> (i32, i32, i32) {
    %c0_i32 = arith.constant 0 : i32
    %c0_i32_0 = arith.constant 0 : i32
    return %arg0, %arg1, %c0_i32 : i32, i32, i32
  }
  func.func @transform_2(%arg0: i32, %arg1: i32) -> (i32, i32, i32) {
    %c0_i32 = arith.constant 0 : i32
    %c0_i32_0 = arith.constant 0 : i32
    %c0_i32_1 = arith.constant 0 : i32
    return %arg0, %c0_i32, %c0_i32_0 : i32, i32, i32
  }
}

</mosaic_0001>

<bundles_post_ra>
// kernel: tpu_custom_call.1
= control target key start
LH: loop header
LB: loop body
LE: loop exit
PB: predicated region body
PF: predicated region fallthrough
CT: control target
= control target key end

     0   :  { %7 = vsyncpa [#allocation6], 0  ;;  %s986_s0 = inlined_call_operand.hbm [shape: f32[2,4,2,128], index: 0, kind: input, shape index: {}]   ;;  %s987_s1 = inlined_call_operand.hbm [shape: s8[2,2,128], index: 1, kind: input, shape index: {}]   ;;  %s988_s2 = inlined_call_operand.hbm [shape: f32[2,8,128], index: 2, kind: output, shape index: {}]  }
   0x1   :  { %9 = vsyncpa [#allocation6 + $0x1], 0 }
   0x2   :  { %10 = vsyncpa [#allocation9], 0 }
   0x3   :  { %12 = vsyncpa [#allocation9 + $0x1], 0 }
   0x4   :  { %13 = vsyncpa [#allocation7], 0 }
   0x5   :  { %15 = vsyncpa [#allocation7 + $0x1], 0  ;;  %s790_s9 = smov 0   ;;  %s792_s10 = smov 0  }
   0x6   :  { %s794_s11 = smov 0   ;;  %s796_s12 = smov 0  }
   0x7   :  { %s798_s13 = smov 0   ;;  %s800_s14 = smov 0  }
   0x8 LB: > { %s531_s15 = sadd.s32 4294967295, %s770_s14   ;;  %s532_s16 = sadd.s32 4294967294, %s770_s14   ;;  %s770_s14 = sphi %s800_s14, %s21_s14   ;;  %s766_s13 = sphi %s798_s13, %s998_s13   ;;  %s762_s12 = sphi %s796_s12, %s997_s12   ;;  %s758_s11 = sphi %s794_s11, %s996_s11   ;;  %s754_s10 = sphi %s792_s10, %s995_s10   ;;  %s750_s9 = sphi %s790_s9, %s994_s9  }
   0x9   : > { %s33_s17 = sadd.s32 1, %s766_s13  ;;  %s42_s18 = sadd.s32 1, %s758_s11 }
   0xa   : > { %p35_p0 = scmp.ge.s32.totalorder %s33_s17, 2  ;;  %p49_p1 = scmp.ne.s32.totalorder %s758_s11, %s754_s10 }
   0xb   : > { %p50_p2 = scmp.eq.s32.totalorder %s770_s14, 0  ;;  %p55_p3 = scmp.ne.s32.totalorder %s754_s10, %s750_s9 }
   0xc   : > { %s1000_s17 = smov (%p35_p0, %s33_s17), 0  ;;  %p56_p5 = scmp.eq.s32.totalorder %s531_s15, 0 }
   0xd   : > { %p831_p4 = por %p50_p2, %p49_p1  ;;  %s37_s20 = ssub.s32 %s766_s13, %s1000_s17 }
   0xe   : > { %p107_p6 = scmp.eq.s32.totalorder %s531_s15, 1  ;;  %p40_p7 = scmp.eq.s32.totalorder %s37_s20, 0 }
   0xf   : > { %p837_p8 = por %p56_p5, %p55_p3  ;;  %p113_p10 = scmp.eq.s32.totalorder %s532_s16, 1 }
  0x10   : > { %p841_p9 = por %p107_p6, %p49_p1  ;;  %p534_p12 = scmp.ge.s32.totalorder %s770_s14, 2 }
  0x11   : > { %s846_s23 = scalar_select %p40_p7, %s758_s11, %s42_s18  }
  0x12   : > { %p848_p11 = por %p113_p10, %p55_p3  ;;  %p569_p13 = scmp.lt.s32.totalorder %s770_s14, 2 }
  0x13   : > { %s133_s25 = sand.u32 1, %s758_s11   ;;  %s549_s27 = sshll.u32 %s766_s13, 3 }
  0x14   : > { %s535_s26 = sshll.u32 %s133_s25, 3  ;;  %s143_s30 = scalar_lea.hbm %s986_s0, %s549_s27 }
  0x15   : > { %s137_s3 = scalar_lea.vmem [#allocation5], %s535_s26  ;;  %s144_s5 = sshll.u32 %s143_s30, 4  ;;  %s145_s5 = int_to_ptr.hbm [resolvable:$true] %s144_s5 }
  0x16   : > { %s146_s4 = sshll.u32 %s137_s3, 4  ;;  %p861_p0 = pnand %p569_p13, %p831_p4  ;;  %s147_s4 = int_to_ptr.vmem [resolvable:$true] %s146_s4 }
  0x17   : > { %p538_p1 = scmp.ge.s32.totalorder %s770_s14, 1  ;;  %s134_s7 = scalar_lea.sflag [#allocation6], %s133_s25 }
  0x18   : > { %s772_s8 = smov 32   ;;  %s773_s15 = smov 2  }
  0x19   : > { %561 = dma.hbm_to_vmem [thread:$0]  (!%p861_p0), %s145_s5, 128, %s147_s4, %s134_s7, %s772_s8, %s772_s8, %s773_s15  }
  0x1a   : > { %p172_p2 = scmp.lt.s32.totalorder %s770_s14, 3  ;;  %s163_s20 = scalar_lea.hbm %s987_s1, %s766_s13 }
  0x1b   : > { %s165_s26 = sshll.u32 %s163_s20, 4  ;;  %s159_s19 = scalar_lea.vmem [#allocation8], %s133_s25  ;;  %s166_s26 = int_to_ptr.hbm [resolvable:$true] %s165_s26 }
  0x1c   : > { %p173_p3 = pnand %p538_p1, %p172_p2  ;;  %s167_s27 = sshll.u32 %s159_s19, 4  ;;  %s168_s27 = int_to_ptr.vmem [resolvable:$true] %s167_s27 }
  0x1d   : > { %s157_s28 = scalar_lea.sflag [#allocation9], %s133_s25  ;;  %s876_s29 = sand.u32 (!%p173_p3), 1, %s754_s10  }
  0x1e   : > { %564 = dma.hbm_to_vmem [thread:$0]  (!%p861_p0), %s166_s26, 16, %s168_s27, %s157_s28  }
  0x1f   : > { %176 = sbr.rel (%p173_p3) target bundleno = 403 (0x193), region = 28  ;;  %s539_s30 = sshll.u32 (!%p173_p3), %s876_s29, 3 }
  0x20   : > { %s179_s3 = scalar_lea.sflag (!%p173_p3), [#allocation6], %s876_s29  ;;  %s182_s4 = scalar_lea.vmem (!%p173_p3), [#allocation5], %s539_s30 }
  0x24   : > { %737 = dma.done.wait (%p837_p8), %s179_s3, 128  }
  0x25   : > { %739 = vsyncadd (%p837_p8), %s179_s3, 4294967168  ;;  %s189_s25 = scalar_lea.sflag [#allocation9], %s876_s29  ;;  %s191_s5 = scalar_lea.vmem [#allocation8], %s876_s29 }
  0x26   : > { %741 = dma.done.wait (%p837_p8), %s189_s25, 16  }
  0x27   : > { %743 = vsyncadd (%p837_p8), %s189_s25, 4294967280  ;;  %v774_v0 = vmov 0.0   ;;  %vm232_vm0 = vcmask 1041408   ;;  %v224_v1 = vld [vmem:[%s182_s4] sm:$0x3]  ;;  %vm350_vm1 = vcmask 1041409  }
  0x28   : > { %222 = vst [vmem:[#allocation3] sm:$0xf] %v774_v0  ;;  %v225_v2 = vld [vmem:[%s182_s4 + $0x2] sm:$0x3]  ;;  %v892_v3 = vld [vmem:[%s182_s4 + $0x4] sm:$0x3] }
  0x29   : > { %221 = vst [vmem:[#allocation2] sm:$0xf] %v774_v0  ;;  %v894_v4 = vld [vmem:[%s182_s4 + $0x6] sm:$0x3]  ;;  %v318_v5 = vsel %vm232_vm0, %v224_v1, 0.0  ;;  %v325_v6 = vsel %vm232_vm0, %v225_v2, 0.0 }
  0x2a   : > { %223 = vst [vmem:[#allocation4] sm:$0xf] %v774_v0  ;;  %v319_v7 = vrot.slane %v318_v5, 4  ;;  %v326_v8 = vrot.slane %v325_v6, 4  ;;  %v332_v9 = vsel %vm232_vm0, %v892_v3, 0.0  ;;  %v339_v10 = vsel %vm232_vm0, %v894_v4, 0.0 }
  0x2b   : > { %v228_v11 = vld [vmem:[%s191_s5] sm:$0x1]  ;;  %v333_v12 = vrot.slane %v332_v9, 4  ;;  %v340_v13 = vrot.slane %v339_v10, 4  ;;  %vm352_vm2 = vcmask 1042434   ;;  %vm354_vm3 = vcmask 1043459  }
  0x2c   : > { %v902_v14 = vunpack.c.0.s8 %v228_v11  ;;  %v320_v15 = vadd.f32 %v319_v7, %v318_v5  ;;  %v327_v16 = vadd.f32 %v326_v8, %v325_v6  ;;  %vm304_vm8 = vcmask 1040384   ;;  %s546_s21 = sshll.u32 %s762_s12, 3  ;;  %s216_s15 = scalar_lea.vmem [#allocation10], %s539_s30 }
  0x2d   : > { %v334_v17 = vadd.f32 %v333_v12, %v332_v9  ;;  %v341_v18 = vadd.f32 %v340_v13, %v339_v10  ;;  %vm363_vm9 = vcmask 1043456   ;;  %vm307_vm10 = vcmask 1042432   ;;  %s426_s8 = scalar_lea.hbm %s988_s2, %s546_s21  ;;  %s428_s16 = sshll.u32 %s216_s15, 4  ;;  %s429_s16 = int_to_ptr.vmem [resolvable:$true] %s428_s16 }
  0x2e   : > { %vm230_vm4 = vcmp.eq.s32.totalorder %v902_v14, 0  ;;  %vm249_vm5 = vcmp.eq.s32.totalorder %v902_v14, 1  ;;  %v321_v19 = vrot.slane %v320_v15, 2  ;;  %v328_v20 = vrot.slane %v327_v16, 2  ;;  %s430_s18 = sshll.u32 %s426_s8, 4  ;;  %s416_s26 = scalar_lea.sflag [#allocation7], %s876_s29  ;;  %s431_s18 = int_to_ptr.hbm [resolvable:$true] %s430_s18 }
  0x2f   : > { %v541_v21 = vsel %vm230_vm4, 1.0, %v774_v0  ;;  %v542_v22 = vsel %vm249_vm5, 1.0, %v774_v0  ;;  %v335_v23 = vrot.slane %v334_v17, 2  ;;  %v342_v24 = vrot.slane %v341_v18, 2  ;;  %v317_v49 = vld [vmem:[#allocation3] sm:$0xf] }
  0x30   : > { %v242_v25 = vsel %vm232_vm0, %v541_v21, 0.0  ;;  %v260_v26 = vsel %vm232_vm0, %v542_v22, 0.0  ;;  %v322_v27 = vadd.f32 %v321_v19, %v320_v15  ;;  %v329_v28 = vadd.f32 %v328_v20, %v327_v16  ;;  %s698_s12 = sshra.s32 %s431_s18, 4  ;;  %s704_s30 = scalar_lea.hbm %s988_s2, 16  ;;  %s699_s12 = int_to_ptr.hbm [resolvable:$true] %s698_s12 }
  0x31   : > { %v243_v29 = vrot.slane %v242_v25, 4  ;;  %v261_v30 = vrot.slane %v260_v26, 4  ;;  %v336_v31 = vadd.f32 %v335_v23, %v334_v17  ;;  %v343_v32 = vadd.f32 %v342_v24, %v341_v18  ;;  %s700_s19 = scalar_lea.hbm %s699_s12, 8  ;;  %p705_p7 = scmp.lt.s32.totalorder %s699_s12, %s988_s2 }
  0x32   : > { %vm267_vm6 = vcmp.eq.s32.totalorder %v902_v14, 2  ;;  %vm285_vm7 = vcmp.eq.s32.totalorder %v902_v14, 3  ;;  %v323_v33 = vrot.slane %v322_v27, 1  ;;  %v330_v34 = vrot.slane %v329_v28, 1  ;;  %p701_p4 = scmp.ne.s32.totalorder %s699_s12, %s700_s19  ;;  %p706_p8 = scmp.lt.s32.totalorder %s704_s30, %s700_s19 }
  0x33   : > { %v244_v35 = vadd.f32 %v243_v29, %v242_v25  ;;  %v262_v36 = vadd.f32 %v261_v30, %v260_v26  ;;  %v337_v37 = vrot.slane %v336_v31, 1  ;;  %v344_v38 = vrot.slane %v343_v32, 1 }
  0x34   : > { %v543_v39 = vsel %vm267_vm6, 1.0, %v774_v0  ;;  %v544_v40 = vsel %vm285_vm7, 1.0, %v774_v0  ;;  %v324_v41 = vadd.f32 %v323_v33, %v322_v27  ;;  %v331_v42 = vadd.f32 %v330_v34, %v329_v28  ;;  %v311_v28 = vld [vmem:[#allocation4] sm:$0xf]  ;;  %p702_p5 = pnand %p701_p4, %p841_p9  ;;  %p707_p10 = por %p706_p8, %p705_p7 }
  0x35   : > { %v245_v43 = vrot.slane %v244_v35, 2  ;;  %v263_v44 = vrot.slane %v262_v36, 2  ;;  %v338_v45 = vadd.f32 %v337_v37, %v336_v31  ;;  %v345_v46 = vadd.f32 %v344_v38, %v343_v32 }
  0x36   : > { %v278_v47 = vsel %vm232_vm0, %v543_v39, 0.0  ;;  %v296_v48 = vsel %vm232_vm0, %v544_v40, 0.0  ;;  %v351_v50 = vsel %vm350_vm1, %v331_v42, %v324_v41  ;;  %v231_v56 = vsel %vm230_vm4, %v224_v1, 0.0  ;;  %p703_p6 = pneg %p702_p5 }
  0x37   : > { %v246_v51 = vadd.f32 %v245_v43, %v244_v35  ;;  %v264_v52 = vadd.f32 %v263_v44, %v262_v36  ;;  %v279_v53 = vrot.slane %v278_v47, 4  ;;  %v353_v54 = vsel %vm352_vm2, %v338_v45, %v351_v50 }
  0x38   : > { %v297_v55 = vrot.slane %v296_v48, 4  ;;  %v250_v57 = vsel %vm249_vm5, %v225_v2, 0.0  ;;  %v355_v58 = vsel %vm354_vm3, %v345_v46, %v353_v54  ;;  %v233_v0 = vsel %vm232_vm0, %v231_v56, 0.0  ;;  %p708_p13 = pnand %p707_p10, %p703_p6 }
  0x39   : > { %v247_v59 = vrot.slane %v246_v51, 1  ;;  %v265_v60 = vrot.slane %v264_v52, 1  ;;  %v280_v61 = vadd.f32 %v279_v53, %v278_v47  ;;  %v357_v62 = vadd.f32 %v355_v58, %v317_v49 }
  0x3a   : > { %v298_v63 = vadd.f32 %v297_v55, %v296_v48  ;;  %v251_v5 = vsel %vm232_vm0, %v250_v57, 0.0  ;;  %v234_v9 = vrot.slane %v233_v0, 4  ;;  %v268_v2 = vsel %vm267_vm6, %v892_v3, 0.0  ;;  %v303_v48 = vld [vmem:[#allocation2] sm:$0xf] }
  0x3b   : > { %v248_v6 = vadd.f32 %v247_v59, %v246_v51  ;;  %v266_v7 = vadd.f32 %v265_v60, %v264_v52  ;;  %v281_v8 = vrot.slane %v280_v61, 2  ;;  %358 = vst [vmem:[#allocation3] sm:$0xf] %v357_v62  ;;  %v252_v10 = vrot.slane %v251_v5, 4 }
  0x3c   : > { %v299_v1 = vrot.slane %v298_v63, 2  ;;  %v286_v11 = vsel %vm285_vm7, %v894_v4, 0.0  ;;  %v235_v13 = vadd.f32 %v234_v9, %v233_v0  ;;  %v269_v15 = vsel %vm232_vm0, %v268_v2, 0.0 }
  0x3d   : > { %v282_v12 = vadd.f32 %v281_v8, %v280_v61  ;;  %v253_v17 = vadd.f32 %v252_v10, %v251_v5  ;;  %v270_v18 = vrot.slane %v269_v15, 4  ;;  %v287_v19 = vsel %vm232_vm0, %v286_v11, 0.0 }
  0x3e   : > { %v300_v16 = vadd.f32 %v299_v1, %v298_v63  ;;  %v236_v21 = vrot.slane %v235_v13, 2  ;;  %v288_v22 = vrot.slane %v287_v19, 4  ;;  %v312_v3 = vsel %vm304_vm8, %v248_v6, %v266_v7 }
  0x3f   : > { %v283_v20 = vrot.slane %v282_v12, 1  ;;  %v254_v24 = vrot.slane %v253_v17, 2  ;;  %v271_v14 = vadd.f32 %v270_v18, %v269_v15  ;;  %vm394_vm15 = vcmask 3072  }
  0x40   : > { %v301_v23 = vrot.slane %v300_v16, 1  ;;  %v237_v25 = vadd.f32 %v236_v21, %v235_v13  ;;  %v289_v26 = vadd.f32 %v288_v22, %v287_v19  ;;  %v405_v21 = vlaneseq }
  0x41   : > { %v284_v4 = vadd.f32 %v283_v20, %v282_v12  ;;  %v255_v29 = vadd.f32 %v254_v24, %v253_v17  ;;  %v272_v30 = vrot.slane %v271_v14, 2 }
  0x42   : > { %v302_v27 = vadd.f32 %v301_v23, %v300_v16  ;;  %v367_v31 = vld [vmem:[#allocation3] sm:$0xf]  ;;  %v238_v33 = vrot.slane %v237_v25, 1  ;;  %v290_v34 = vrot.slane %v289_v26, 2  ;;  %v406_v22 = vshrl.u32 %v405_v21, 7 }
  0x43   : > { %v313_v32 = vsel %vm232_vm0, %v312_v3, %v284_v4  ;;  %v368_v35 = vsel %vm363_vm9, %v367_v31, 0.0  ;;  %v256_v37 = vrot.slane %v255_v29, 1  ;;  %v273_v38 = vadd.f32 %v272_v30, %v271_v14 }
  0x44   : > { %v314_v36 = vsel %vm307_vm10, %v313_v32, %v302_v27  ;;  %369 = vadd.xlane.f32.xlu0 %v368_v35  ;;  %v239_v40 = vadd.f32 %v238_v33, %v237_v25  ;;  %v291_v41 = vadd.f32 %v290_v34, %v289_v26  ;;  %v408_v23 = vand.u32 127, %v405_v21 }
  0x45   : > { %v315_v39 = vadd.f32 %v314_v36, %v311_v28  ;;  %v257_v42 = vadd.f32 %v256_v37, %v255_v29  ;;  %v274_v43 = vrot.slane %v273_v38, 1 }
  0x46   : > { %v292_v44 = vrot.slane %v291_v41, 1  ;;  %vm410_vm1 = vcmp.eq.s32.totalorder %v408_v23, 0 }
  0x47   : > { %316 = vst [vmem:[#allocation4] sm:$0xf] %v315_v39  ;;  %v275_v45 = vadd.f32 %v274_v43, %v273_v38  ;;  %v305_v46 = vsel %vm304_vm8, %v239_v40, %v257_v42 }
  0x48   : > { %v293_v47 = vadd.f32 %v292_v44, %v291_v41 }
  0x49   : > { %v306_v49 = vsel %vm232_vm0, %v305_v46, %v275_v45  ;;  %vm409_vm0 = vcmp.eq.s32.totalorder %v406_v22, 0 }
  0x4a   : > { %v308_v50 = vsel %vm307_vm10, %v306_v49, %v293_v47  ;;  %vm411_vm2 = vmand %vm409_vm0, %vm410_vm1 }
  0x4b   : > { %v309_v51 = vadd.f32 %v308_v50, %v303_v48 }
  0x4d   : > { %310 = vst [vmem:[#allocation2] sm:$0xf] %v309_v51 }
  0x4e   : > { %v371_v52 = vld [vmem:[#allocation4] sm:$0xf] }
  0x4f   : > { %v372_v53 = vsel %vm363_vm9, %v371_v52, 0.0 }
  0x50   : > { %373 = vadd.xlane.f32.xlu0 %v372_v53 }
  0x54   : > { %v362_v54 = vld [vmem:[#allocation2] sm:$0xf] }
  0x55   : > { %v364_v55 = vsel %vm363_vm9, %v362_v54, 0.0 }
  0x56   : > { %365 = vadd.xlane.f32.xlu1 %v364_v55 }
  0xb7   : > { %v370_v56 = vpop.xlane.xlu0 %369 }
  0xc3   : > { %v374_v57 = vpop.xlane.xlu0 %373 }
  0xc4   : > { %v377_v58 = vadd.f32 %v374_v57, %v370_v56 }
  0xc6   : > { %v378_v59 = vadd.f32 1e-06, %v377_v58 }
  0xc8   : > { %622 = vrcp.f32 %v378_v59  ;;  %v390_v5 = vand.u32 2147483648, %v378_v59  ;;  %v388_v7 = vand.u32 2147483647, %v378_v59  ;;  %vm384_vm12 = vweird.f32 %v378_v59 }
  0xc9   : > { %v366_v61 = vpop.xlane.xlu1 %365 }
  0xca   : > { %v375_v0 = vmul.f32 2.0, %v366_v61  ;;  %v391_v1 = vor.u32 1.1754944e-38, %v390_v5  ;;  %vm389_vm14 = vcmp.eq.f32.partialorder %v388_v7, 8.507059e+37 }
  0xcc   : > { %v376_v8 = vadd.f32 1e-06, %v375_v0 }
  0xce   : > { %v623_v60 = vpop.eup %622 }
  0xcf   : > { %v380_v62 = vmul.f32 %v623_v60, %v378_v59  ;;  %vm385_vm11 = vweird.f32 %v623_v60 }
  0xd0   : > { %vm386_vm13 = vmor %vm384_vm12, %vm385_vm11 }
  0xd1   : > { %v381_v63 = vsub.f32 1.0, %v380_v62 }
  0xd3   : > { %v382_v6 = vmul.f32 %v623_v60, %v381_v63 }
  0xd5   : > { %v383_v9 = vadd.f32 %v623_v60, %v382_v6 }
  0xd7   : > { %v387_v10 = vsel %vm386_vm13, %v623_v60, %v383_v9 }
  0xd8   : > { %v392_v2 = vsel %vm389_vm14, %v391_v1, %v387_v10 }
  0xd9   : > { %v393_v11 = vmul.f32 %v392_v2, %v376_v8 }
  0xdb   : > { %v395_v12 = vsel %vm394_vm15, %v393_v11, 0.0 }
  0xdc   : > { %396 = vadd.xlane.f32.xlu1 %v395_v12 }
 0x14f   : > { %v397_v13 = vpop.xlane.xlu1 %396 }
 0x150   : > { %v398_v15 = vrot.slane %v397_v13, 4 }
 0x152   : > { %v399_v16 = vadd.f32 %v398_v15, %v397_v13 }
 0x154   : > { %v400_v17 = vrot.slane %v399_v16, 2 }
 0x156   : > { %v401_v18 = vadd.f32 %v400_v17, %v399_v16 }
 0x158   : > { %v402_v19 = vrot.slane %v401_v18, 1 }
 0x15a   : > { %v403_v20 = vadd.f32 %v402_v19, %v401_v18 }
 0x15c   : > { %550 = vpush %v403_v20 }
 0x18d   : > { %s551_s20 = spop %550 }
 0x18e   : > { %v412_v3 = vstv %s551_s20 }
 0x18f   : > { %v413_v24 = vsel %vm411_vm2, %v412_v3, 0.0 }
 0x190   : > { %414 = vst [vmem:[%s216_s15] sm:$0xff] %v413_v24 }
 0x191   : > { %711 = shalt.err (!%p708_p13)
}
 0x192   : > { %556 = dma.vmem_to_hbm [thread:$0]  (%p841_p9), %s429_s16, 128, %s431_s18, %s416_s26  }
 0x193 PF: > { %s442_s29 = sand.u32 1, %s750_s9   ;;  %p566_p0 = pnand %p534_p12, %p848_p11 }
 0x194   : > { %s443_s25 = scalar_lea.sflag [#allocation7], %s442_s29 }
 0x195   : > { %p567_p1 = pneg %p566_p0 }
 0x197   : > { %745 = dma.done.wait (%p567_p1), %s443_s25, 128  }
 0x198   : > { %747 = vsyncadd (%p567_p1), %s443_s25, 4294967168  ;;  %s21_s14 = sadd.s32 1, %s770_s14   ;;  %s994_s9 = smov %s754_s10 }
 0x199   : > { %p18_p2 = scmp.ge.s32.totalorder %s21_s14, 4   ;;  %s995_s10 = smov %s758_s11 }
 0x19a   : > { %s996_s11 = smov %s846_s23  ;;  %s997_s12 = smov %s766_s13 }
 0x19b   : > { %s998_s13 = smov %s1000_s17  ;;  %20 = sbr.rel (!%p18_p2) target bundleno = 8 (0x8), region = 94 }
 0x1a0   :  { %449 = vsyncpa [#allocation6], 1 }
 0x1a1   :  { %451 = vsyncpa [#allocation6 + $0x1], 1 }
 0x1a2   :  { %452 = vsyncpa [#allocation9], 1 }
 0x1a3   :  { %454 = vsyncpa [#allocation9 + $0x1], 1 }
 0x1a4   :  { %455 = vsyncpa [#allocation7], 1 }
 0x1a5   :  { %457 = vsyncpa [#allocation7 + $0x1], 1 }

</bundles_post_ra>
